<compile_context>
chip_gen: v5e
topology: v5e:2x2
jax: 0.10.0
libtpu: 0.0.40
codegen_flags: <defaults>
</compile_context>

<pallas_src>
import jax
import jax.numpy as jnp
import numpy as np
from jax.experimental import pallas as pl
from jax.experimental.pallas import tpu as pltpu

FP = 128      # padded input-feature lane width
CP = 128      # padded hidden / fc lane width
NSP = 128     # padded source-node count (lane axis of adj / logits / alpha)
NEG_INF = -1e30

# lane offsets of the three fc layers inside the packed [CP, CP] weight slab
L1_OFF, L2_OFF, OUT_LANE = 32, 64, 96

# rows of the packed [VEC_ROWS, CP] small-vector slab:
#   per edge type t in {0,1}: rows 3*t+0/1/2 = att_src, att_dst, GAT bias
#   rows 6/7/8 = fc biases b1/b2/b3 (stored at their fc lane offsets)
ROW_ATT_SRC, ROW_ATT_DST, ROW_GBIAS = 0, 1, 2
ROW_MB1, ROW_MB2, ROW_MB3 = 6, 7, 8
VEC_ROWS = 16


def _pad2(a, rows, cols, dtype=jnp.float32):
    out = jnp.zeros((rows, cols), dtype)
    return out.at[: a.shape[0], : a.shape[1]].set(a.astype(dtype))


# ---------------------------------------------------------------------------
# Single fused kernel: both hetero GATConv(+ReLU) edge types plus the fc head,
# one grid step, one output store per row-block.  All activations stay in
# VMEM/vregs; only the final results go back to HBM.
# NOTE: at realistic node counts, switch to a tiled online softmax over source
# tiles -- size the (dst-tile x src-tile) working set for v7x's 64 MiB VMEM
# (about half the tile v5e/v6e's 128 MiB allows), use 256-wide M/N MXU tiles on
# v6e/v7x (128 on v5e), and shard destination tiles over a "parallel" grid.
# ---------------------------------------------------------------------------
def _fused_kernel(xs_ref, xd_ref, adj_ref, ws_ref, wd_ref, vec_ref, mw_ref, o_ref):
    vec = vec_ref[...]          # [VEC_ROWS, CP] f32, packed small vectors (1 DMA, not 6)
    mw = mw_ref[...]            # [CP, CP] bf16, packed fc Linear1/2/3 slab

    def gat_conv_relu(t):
        # GATConv (1 head, add_self_loops=False) for hetero edge type t, + ReLU.
        base = 3 * t
        att_src = vec[base + ROW_ATT_SRC:base + ROW_ATT_SRC + 1, :]      # [1, CP]
        att_dst = vec[base + ROW_ATT_DST:base + ROW_ATT_DST + 1, :]      # [1, CP]
        g_bias = vec[base + ROW_GBIAS:base + ROW_GBIAS + 1, :]           # [1, CP]

        # bf16 x bf16 -> f32-accumulated MXU matmuls (slabs stored bf16)
        h_src = jnp.dot(xs_ref[t], ws_ref[t],
                        preferred_element_type=jnp.float32)              # [NSP, CP]
        h_dst = jnp.dot(xd_ref[t], wd_ref[t],
                        preferred_element_type=jnp.float32)              # [ND,  CP]

        # attention logits: destination term on the VPU (lane reduce); source
        # term as one MXU row, which yields the [1, NSP] layout directly
        # (avoids a [NSP,1] -> [1,NSP] cross-lane relayout).
        a_dst = jnp.sum(h_dst * att_dst, axis=-1, keepdims=True)         # [ND, 1]
        a_src = jax.lax.dot_general(att_src, h_src, (((1,), (1,)), ((), ())),
                                    preferred_element_type=jnp.float32)  # [1, NSP]

        e = a_dst + a_src                                                # [ND, NSP]
        e = jnp.where(e >= 0.0, e, 0.2 * e)            # leaky_relu, slope 0.2
        adj = adj_ref[t]                               # 0/1 float adjacency
        e = jnp.where(adj > 0.0, e, NEG_INF)
        # 0/1 adj multiply masks non-edges AND zeroes isolated dst rows in one op
        p = jnp.exp(e - jnp.max(e, axis=-1, keepdims=True)) * adj
        denom = jnp.sum(p, axis=-1, keepdims=True)
        # non-isolated rows have denom >= 1 (max entry contributes exp(0)=1);
        # isolated rows have p == 0, so clamping denom to 1 keeps alpha == 0
        inv = pl.reciprocal(jnp.maximum(denom, 1.0), approx=True)        # EUP
        alpha = p * inv

        h = jnp.dot(alpha, h_src, preferred_element_type=jnp.float32) + g_bias
        return jnp.maximum(h, 0.0)                     # nn.ReLU after HeteroConv

    h1 = gat_conv_relu(0)   # ('0','a','1') -> type-'1' activations, feeds the fc head
    h0 = gat_conv_relu(1)   # ('1','b','0') -> type-'0' activations (unused by fc)

    # each output row-block written exactly once (no redundant whole-tile vst)
    o_ref[1] = h0

    # fc head: Linear(2,2)+ReLU, Linear(2,4)+ReLU, Linear(4,1)+Sigmoid, all via
    # the packed [CP, CP] slab (disjoint row/lane blocks => chaining is exact)
    mb1 = vec[ROW_MB1:ROW_MB1 + 1, :]
    mb2 = vec[ROW_MB2:ROW_MB2 + 1, :]
    mb3 = vec[ROW_MB3:ROW_MB3 + 1, :]
    y = jnp.maximum(jnp.dot(h1, mw, preferred_element_type=jnp.float32) + mb1, 0.0)
    y = jnp.maximum(jnp.dot(y, mw, preferred_element_type=jnp.float32) + mb2, 0.0)
    y = jnp.dot(y, mw, preferred_element_type=jnp.float32) + mb3
    o_ref[0] = pl.reciprocal(1.0 + jnp.exp(-y), approx=True)   # sigmoid (EUP)


def _forward(xs_all, xd_all, adj_all, ws_all, wd_all, vec_all, mlp_w):
    nd = xd_all.shape[1]
    out_all = pl.pallas_call(
        _fused_kernel,
        out_shape=jax.ShapeDtypeStruct((2, nd, CP), jnp.float32),
        grid=(1,),
        in_specs=[
            pl.BlockSpec((2, NSP, FP), lambda i: (0, 0, 0)),   # x_src, both edge types (bf16)
            pl.BlockSpec((2, nd, FP), lambda i: (0, 0, 0)),    # x_dst (bf16)
            pl.BlockSpec((2, nd, NSP), lambda i: (0, 0, 0)),   # dense adjacency (f32, lane-dense)
            pl.BlockSpec((2, FP, CP), lambda i: (0, 0, 0)),    # W_src (bf16)
            pl.BlockSpec((2, FP, CP), lambda i: (0, 0, 0)),    # W_dst (bf16)
            pl.BlockSpec((VEC_ROWS, CP), lambda i: (0, 0)),    # packed att/bias vectors (f32)
            pl.BlockSpec((CP, CP), lambda i: (0, 0)),          # packed fc weight slab (bf16)
        ],
        out_specs=pl.BlockSpec((2, nd, CP), lambda i: (0, 0, 0)),
        compiler_params=pltpu.CompilerParams(
            dimension_semantics=("arbitrary",)),
    )(xs_all, xd_all, adj_all, ws_all, wd_all, vec_all, mlp_w)
    # keep the lane-dense store; slice the fc lane outside the kernel
    out = out_all[0, :, OUT_LANE:OUT_LANE + 1]     # fc head output, [N1, 1]
    h0 = out_all[1]                                # type-'0' conv activations (padded)
    return out, h0


forward = jax.jit(_forward)


if __name__ == "__main__":
    node_features = 8
    N0, N1 = 16, 16          # equal here; pad x_dst to max(N0, N1) if they differ
    C = 2                    # conv_layers[-1] == fc_layers[0]

    key = jax.random.PRNGKey(0)
    keys = jax.random.split(key, 16)

    def bf16_round(a):
        # round once so the kernel's bf16 slabs and the f32 reference see the
        # exact same values (the MXU accumulates bf16 products in f32 exactly)
        return a.astype(jnp.bfloat16).astype(jnp.float32)

    # ---- inputs: x_dict and edge_index_dict ----
    x0 = bf16_round(jax.random.normal(keys[0], (N0, node_features), jnp.float32))  # type '0'
    x1 = bf16_round(jax.random.normal(keys[1], (N1, node_features), jnp.float32))  # type '1'
    i0, i1 = jnp.arange(N0), jnp.arange(N1)
    # deterministic, duplicate-free edges
    edge_a = jnp.stack([jnp.concatenate([i0, i0]),                       # ('0','a','1')
                        jnp.concatenate([i0 % N1, (3 * i0 + 1) % N1])])
    edge_b = jnp.stack([jnp.concatenate([i1, i1]),                       # ('1','b','0')
                        jnp.concatenate([i1 % N0, (5 * i1 + 2) % N0])])

    def dense_adj(edge_index, n_dst, n_src):
        src, dst = edge_index[0], edge_index[1]
        return jnp.zeros((n_dst, n_src), jnp.float32).at[dst, src].set(1.0)

    adj_a = dense_adj(edge_a, N1, N0)   # messages '0' -> '1'
    adj_b = dense_adj(edge_b, N0, N1)   # messages '1' -> '0'

    # ---- deterministic parameter init (weights stored as [in, out]) ----
    def glorot(k, shape):
        lim = float(np.sqrt(6.0 / (shape[0] + shape[1])))
        return jax.random.uniform(k, shape, jnp.float32, -lim, lim)

    gat_a = dict(w_src=bf16_round(glorot(keys[2], (node_features, C))),
                 w_dst=bf16_round(glorot(keys[3], (node_features, C))),
                 att_src=glorot(keys[4], (1, C)),
                 att_dst=glorot(keys[5], (1, C)),
                 bias=jnp.zeros((1, C), jnp.float32))    # PyG GATConv bias init = zeros
    gat_b = dict(w_src=bf16_round(glorot(keys[6], (node_features, C))),
                 w_dst=bf16_round(glorot(keys[7], (node_features, C))),
                 att_src=glorot(keys[8], (1, C)),
                 att_dst=glorot(keys[9], (1, C)),
                 bias=jnp.zeros((1, C), jnp.float32))
    W1 = bf16_round(glorot(keys[10], (2, 2)))
    W2 = bf16_round(glorot(keys[11], (2, 4)))
    W3 = bf16_round(glorot(keys[12], (4, 1)))
    b1 = jax.random.uniform(keys[13], (1, 2), jnp.float32, -0.5, 0.5)
    b2 = jax.random.uniform(keys[14], (1, 4), jnp.float32, -0.5, 0.5)
    b3 = jax.random.uniform(keys[15], (1, 1), jnp.float32, -0.5, 0.5)

    # ---- one-time padding / packing of all operands (hoisted out of the
    #      forward path: nothing below is re-materialised per forward).
    #      Big MXU slabs are stored bf16 (half the DMA bytes). ----
    ND = max(N0, N1)
    BF = jnp.bfloat16
    xs_all = jnp.stack([_pad2(x0, NSP, FP, BF), _pad2(x1, NSP, FP, BF)])
    xd_all = jnp.stack([_pad2(x1, ND, FP, BF), _pad2(x0, ND, FP, BF)])
    adj_all = jnp.stack([_pad2(adj_a, ND, NSP), _pad2(adj_b, ND, NSP)])
    ws_all = jnp.stack([_pad2(gat_a["w_src"], FP, CP, BF), _pad2(gat_b["w_src"], FP, CP, BF)])
    wd_all = jnp.stack([_pad2(gat_a["w_dst"], FP, CP, BF), _pad2(gat_b["w_dst"], FP, CP, BF)])

    # all six tiny [1, CP] vectors packed into ONE f32 slab (one DMA stream)
    vec_all = jnp.zeros((VEC_ROWS, CP), jnp.float32)
    for t, prm in enumerate((gat_a, gat_b)):
        vec_all = vec_all.at[3 * t + ROW_ATT_SRC, :C].set(prm["att_src"][0])
        vec_all = vec_all.at[3 * t + ROW_ATT_DST, :C].set(prm["att_dst"][0])
        vec_all = vec_all.at[3 * t + ROW_GBIAS, :C].set(prm["bias"][0])
    vec_all = vec_all.at[ROW_MB1, L1_OFF:L1_OFF + 2].set(b1[0])
    vec_all = vec_all.at[ROW_MB2, L2_OFF:L2_OFF + 4].set(b2[0])
    vec_all = vec_all.at[ROW_MB3, OUT_LANE:OUT_LANE + 1].set(b3[0])

    # pack the three fc weight matrices into ONE [CP, CP] bf16 slab at disjoint
    # row/lane blocks; chaining h @ slab three times applies Linear1/2/3.
    mlp_w = jnp.zeros((CP, CP), jnp.float32)
    mlp_w = mlp_w.at[0:2, L1_OFF:L1_OFF + 2].set(W1)
    mlp_w = mlp_w.at[L1_OFF:L1_OFF + 2, L2_OFF:L2_OFF + 4].set(W2)
    mlp_w = mlp_w.at[L2_OFF:L2_OFF + 4, OUT_LANE:OUT_LANE + 1].set(W3)
    mlp_w = mlp_w.astype(BF)

    # ---- forward (single fused Pallas call, single grid step) ----
    out, h0_pad = forward(xs_all, xd_all, adj_all, ws_all, wd_all,
                          vec_all, mlp_w)
    out = out[:N1]                                   # [N1, 1], matches torch output
    jax.block_until_ready(out)
    jax.block_until_ready(h0_pad)

    # ---- pure-JAX reference (f32, same bf16-representable parameter values) ----
    def ref_gat_relu(x_src, x_dst, adj, prm):
        h_src = x_src @ prm["w_src"]
        h_dst = x_dst @ prm["w_dst"]
        a_s = (h_src * prm["att_src"]).sum(-1)[None, :]
        a_d = (h_dst * prm["att_dst"]).sum(-1)[:, None]
        e = a_d + a_s
        e = jnp.where(e >= 0, e, 0.2 * e)
        m = adj > 0
        e = jnp.where(m, e, NEG_INF)
        pm = jnp.where(m, jnp.exp(e - jnp.max(e, -1, keepdims=True)), 0.0)
        den = pm.sum(-1, keepdims=True)
        alpha = jnp.where(den > 0, pm / jnp.where(den > 0, den, 1.0), 0.0)
        return jnp.maximum(alpha @ h_src + prm["bias"], 0.0)

    r1 = ref_gat_relu(x0, x1, adj_a, gat_a)          # HeteroConv output for type '1'
    r0 = ref_gat_relu(x1, x0, adj_b, gat_b)          # HeteroConv output for type '0'
    y = jnp.maximum(r1 @ W1 + b1, 0.0)
    y = jnp.maximum(y @ W2 + b2, 0.0)
    ref = jax.nn.sigmoid(y @ W3 + b3)

    np.testing.assert_allclose(np.asarray(out), np.asarray(ref), rtol=2e-2, atol=2e-2)
    np.testing.assert_allclose(np.asarray(h0_pad[:N0, :C]), np.asarray(r0),
                               rtol=2e-2, atol=2e-2)
    print("KERNEL_OK")
</pallas_src>

<mosaic_0001>
module attributes {stable_mosaic.version = 11 : i64} {
  func.func @_fused_kernel(%arg0: i32, %arg1: memref<2x128x128xbf16, #tpu.memory_space<vmem>>, %arg2: memref<2x16x128xbf16, #tpu.memory_space<vmem>>, %arg3: memref<2x16x128xf32, #tpu.memory_space<vmem>>, %arg4: memref<2x128x128xbf16, #tpu.memory_space<vmem>>, %arg5: memref<2x128x128xbf16, #tpu.memory_space<vmem>>, %arg6: memref<16x128xf32, #tpu.memory_space<vmem>>, %arg7: memref<128x128xbf16, #tpu.memory_space<vmem>>, %arg8: memref<2x16x128xf32, #tpu.memory_space<vmem>>) attributes {dimension_semantics = [#tpu.dimension_semantics<arbitrary>], iteration_bounds = array<i64: 1>, scalar_prefetch = 0 : i64, scratch_operands = 0 : i64, tpu.core_type = #tpu.core_type<tc>, window_params = [{pipeline_mode = #tpu.pipeline_mode<synchronous>, transform_indices = @transform_0, window_bounds = array<i64: 2, 128, 128>}, {pipeline_mode = #tpu.pipeline_mode<synchronous>, transform_indices = @transform_1, window_bounds = array<i64: 2, 16, 128>}, {pipeline_mode = #tpu.pipeline_mode<synchronous>, transform_indices = @transform_2, window_bounds = array<i64: 2, 16, 128>}, {pipeline_mode = #tpu.pipeline_mode<synchronous>, transform_indices = @transform_3, window_bounds = array<i64: 2, 128, 128>}, {pipeline_mode = #tpu.pipeline_mode<synchronous>, transform_indices = @transform_4, window_bounds = array<i64: 2, 128, 128>}, {pipeline_mode = #tpu.pipeline_mode<synchronous>, transform_indices = @transform_5, window_bounds = array<i64: 16, 128>}, {pipeline_mode = #tpu.pipeline_mode<synchronous>, transform_indices = @transform_6, window_bounds = array<i64: 128, 128>}, {pipeline_mode = #tpu.pipeline_mode<synchronous>, transform_indices = @transform_7, window_bounds = array<i64: 2, 16, 128>}]} {
    %c0 = arith.constant 0 : index
    %c0_0 = arith.constant 0 : index
    %0 = vector.load %arg6[%c0, %c0_0] : memref<16x128xf32, #tpu.memory_space<vmem>>, vector<16x128xf32>
    %c0_1 = arith.constant 0 : index
    %c0_2 = arith.constant 0 : index
    %1 = vector.load %arg7[%c0_1, %c0_2] : memref<128x128xbf16, #tpu.memory_space<vmem>>, vector<128x128xbf16>
    %2 = vector.extract_strided_slice %0 {offsets = [0, 0], sizes = [1, 128], strides = [1, 1]} : vector<16x128xf32> to vector<1x128xf32>
    %3 = vector.extract_strided_slice %0 {offsets = [1, 0], sizes = [1, 128], strides = [1, 1]} : vector<16x128xf32> to vector<1x128xf32>
    %4 = vector.extract_strided_slice %0 {offsets = [2, 0], sizes = [1, 128], strides = [1, 1]} : vector<16x128xf32> to vector<1x128xf32>
    %c0_3 = arith.constant 0 : index
    %c0_4 = arith.constant 0 : index
    %c0_5 = arith.constant 0 : index
    %5 = vector.load %arg1[%c0_3, %c0_4, %c0_5] : memref<2x128x128xbf16, #tpu.memory_space<vmem>>, vector<1x128x128xbf16>
    %6 = vector.shape_cast %5 : vector<1x128x128xbf16> to vector<128x128xbf16>
    %c0_6 = arith.constant 0 : index
    %c0_7 = arith.constant 0 : index
    %c0_8 = arith.constant 0 : index
    %7 = vector.load %arg4[%c0_6, %c0_7, %c0_8] : memref<2x128x128xbf16, #tpu.memory_space<vmem>>, vector<1x128x128xbf16>
    %8 = vector.shape_cast %7 : vector<1x128x128xbf16> to vector<128x128xbf16>
    %cst = arith.constant dense<0.000000e+00> : vector<128x128xf32>
    %9 = tpu.matmul %6, %8, %cst {dimension_numbers = #tpu.dot_dimension_numbers<[1], [0], [0], [1], [0, 0, 1, 1], [], []>} : vector<128x128xbf16>, vector<128x128xbf16>, vector<128x128xf32> -> vector<128x128xf32>
    %c0_9 = arith.constant 0 : index
    %c0_10 = arith.constant 0 : index
    %c0_11 = arith.constant 0 : index
    %10 = vector.load %arg2[%c0_9, %c0_10, %c0_11] : memref<2x16x128xbf16, #tpu.memory_space<vmem>>, vector<1x16x128xbf16>
    %11 = vector.shape_cast %10 : vector<1x16x128xbf16> to vector<16x128xbf16>
    %c0_12 = arith.constant 0 : index
    %c0_13 = arith.constant 0 : index
    %c0_14 = arith.constant 0 : index
    %12 = vector.load %arg5[%c0_12, %c0_13, %c0_14] : memref<2x128x128xbf16, #tpu.memory_space<vmem>>, vector<1x128x128xbf16>
    %13 = vector.shape_cast %12 : vector<1x128x128xbf16> to vector<128x128xbf16>
    %cst_15 = arith.constant dense<0.000000e+00> : vector<16x128xf32>
    %14 = tpu.matmul %11, %13, %cst_15 {dimension_numbers = #tpu.dot_dimension_numbers<[1], [0], [0], [1], [0, 0, 1, 1], [], []>} : vector<16x128xbf16>, vector<128x128xbf16>, vector<16x128xf32> -> vector<16x128xf32>
    %15 = vector.broadcast %3 : vector<1x128xf32> to vector<16x128xf32>
    %16 = arith.mulf %14, %15 : vector<16x128xf32>
    %cst_16 = arith.constant dense<0.000000e+00> : vector<16xf32>
    %17 = vector.multi_reduction <add>, %16, %cst_16 [1] : vector<16x128xf32> to vector<16xf32>
    %18 = vector.shape_cast %17 : vector<16xf32> to vector<16x1xf32>
    %cst_17 = arith.constant dense<0.000000e+00> : vector<1x128xf32>
    %19 = tpu.matmul %2, %9, %cst_17 {dimension_numbers = #tpu.dot_dimension_numbers<[1], [1], [0], [0], [0, 0, 1, 0], [], []>} : vector<1x128xf32>, vector<128x128xf32>, vector<1x128xf32> -> vector<1x128xf32>
    %20 = vector.broadcast %18 : vector<16x1xf32> to vector<16x128xf32>
    %21 = vector.broadcast %19 : vector<1x128xf32> to vector<16x128xf32>
    %22 = arith.addf %20, %21 : vector<16x128xf32>
    %cst_18 = arith.constant 0.000000e+00 : f32
    %23 = vector.broadcast %cst_18 : f32 to vector<16x128xf32>
    %24 = arith.cmpf oge, %22, %23 : vector<16x128xf32>
    %cst_19 = arith.constant 2.000000e-01 : f32
    %25 = vector.broadcast %cst_19 : f32 to vector<16x128xf32>
    %26 = arith.mulf %25, %22 : vector<16x128xf32>
    %27 = arith.select %24, %22, %26 : vector<16x128xi1>, vector<16x128xf32>
    %c0_20 = arith.constant 0 : index
    %c0_21 = arith.constant 0 : index
    %c0_22 = arith.constant 0 : index
    %28 = vector.load %arg3[%c0_20, %c0_21, %c0_22] : memref<2x16x128xf32, #tpu.memory_space<vmem>>, vector<1x16x128xf32>
    %29 = vector.shape_cast %28 : vector<1x16x128xf32> to vector<16x128xf32>
    %cst_23 = arith.constant 0.000000e+00 : f32
    %30 = vector.broadcast %cst_23 : f32 to vector<16x128xf32>
    %31 = arith.cmpf ogt, %29, %30 : vector<16x128xf32>
    %cst_24 = arith.constant -1.000000e+30 : f32
    %32 = vector.broadcast %cst_24 : f32 to vector<16x128xf32>
    %33 = arith.select %31, %27, %32 : vector<16x128xi1>, vector<16x128xf32>
    %cst_25 = arith.constant dense<0xFF800000> : vector<16xf32>
    %34 = vector.multi_reduction <maximumf>, %33, %cst_25 [1] : vector<16x128xf32> to vector<16xf32>
    %35 = vector.shape_cast %34 : vector<16xf32> to vector<16x1xf32>
    %36 = vector.broadcast %35 : vector<16x1xf32> to vector<16x128xf32>
    %37 = arith.subf %33, %36 : vector<16x128xf32>
    %38 = math.exp %37 : vector<16x128xf32>
    %39 = arith.mulf %38, %29 : vector<16x128xf32>
    %cst_26 = arith.constant dense<0.000000e+00> : vector<16xf32>
    %40 = vector.multi_reduction <add>, %39, %cst_26 [1] : vector<16x128xf32> to vector<16xf32>
    %41 = vector.shape_cast %40 : vector<16xf32> to vector<16x1xf32>
    %cst_27 = arith.constant 1.000000e+00 : f32
    %42 = vector.broadcast %cst_27 : f32 to vector<16x1xf32>
    %43 = arith.maximumf %41, %42 : vector<16x1xf32>
    %44 = tpu.reciprocal %43 {approx = true} : vector<16x1xf32> -> vector<16x1xf32>
    %45 = vector.broadcast %44 : vector<16x1xf32> to vector<16x128xf32>
    %46 = arith.mulf %39, %45 : vector<16x128xf32>
    %cst_28 = arith.constant dense<0.000000e+00> : vector<16x128xf32>
    %47 = tpu.matmul %46, %9, %cst_28 {dimension_numbers = #tpu.dot_dimension_numbers<[1], [0], [0], [1], [0, 0, 1, 1], [], []>} : vector<16x128xf32>, vector<128x128xf32>, vector<16x128xf32> -> vector<16x128xf32>
    %48 = vector.broadcast %4 : vector<1x128xf32> to vector<16x128xf32>
    %49 = arith.addf %47, %48 : vector<16x128xf32>
    %cst_29 = arith.constant 0.000000e+00 : f32
    %50 = vector.broadcast %cst_29 : f32 to vector<16x128xf32>
    %51 = arith.maximumf %49, %50 : vector<16x128xf32>
    %52 = vector.extract_strided_slice %0 {offsets = [3, 0], sizes = [1, 128], strides = [1, 1]} : vector<16x128xf32> to vector<1x128xf32>
    %53 = vector.extract_strided_slice %0 {offsets = [4, 0], sizes = [1, 128], strides = [1, 1]} : vector<16x128xf32> to vector<1x128xf32>
    %54 = vector.extract_strided_slice %0 {offsets = [5, 0], sizes = [1, 128], strides = [1, 1]} : vector<16x128xf32> to vector<1x128xf32>
    %c1 = arith.constant 1 : index
    %c0_30 = arith.constant 0 : index
    %c0_31 = arith.constant 0 : index
    %55 = vector.load %arg1[%c1, %c0_30, %c0_31] : memref<2x128x128xbf16, #tpu.memory_space<vmem>>, vector<1x128x128xbf16>
    %56 = vector.shape_cast %55 : vector<1x128x128xbf16> to vector<128x128xbf16>
    %c1_32 = arith.constant 1 : index
    %c0_33 = arith.constant 0 : index
    %c0_34 = arith.constant 0 : index
    %57 = vector.load %arg4[%c1_32, %c0_33, %c0_34] : memref<2x128x128xbf16, #tpu.memory_space<vmem>>, vector<1x128x128xbf16>
    %58 = vector.shape_cast %57 : vector<1x128x128xbf16> to vector<128x128xbf16>
    %cst_35 = arith.constant dense<0.000000e+00> : vector<128x128xf32>
    %59 = tpu.matmul %56, %58, %cst_35 {dimension_numbers = #tpu.dot_dimension_numbers<[1], [0], [0], [1], [0, 0, 1, 1], [], []>} : vector<128x128xbf16>, vector<128x128xbf16>, vector<128x128xf32> -> vector<128x128xf32>
    %c1_36 = arith.constant 1 : index
    %c0_37 = arith.constant 0 : index
    %c0_38 = arith.constant 0 : index
    %60 = vector.load %arg2[%c1_36, %c0_37, %c0_38] : memref<2x16x128xbf16, #tpu.memory_space<vmem>>, vector<1x16x128xbf16>
    %61 = vector.shape_cast %60 : vector<1x16x128xbf16> to vector<16x128xbf16>
    %c1_39 = arith.constant 1 : index
    %c0_40 = arith.constant 0 : index
    %c0_41 = arith.constant 0 : index
    %62 = vector.load %arg5[%c1_39, %c0_40, %c0_41] : memref<2x128x128xbf16, #tpu.memory_space<vmem>>, vector<1x128x128xbf16>
    %63 = vector.shape_cast %62 : vector<1x128x128xbf16> to vector<128x128xbf16>
    %cst_42 = arith.constant dense<0.000000e+00> : vector<16x128xf32>
    %64 = tpu.matmul %61, %63, %cst_42 {dimension_numbers = #tpu.dot_dimension_numbers<[1], [0], [0], [1], [0, 0, 1, 1], [], []>} : vector<16x128xbf16>, vector<128x128xbf16>, vector<16x128xf32> -> vector<16x128xf32>
    %65 = vector.broadcast %53 : vector<1x128xf32> to vector<16x128xf32>
    %66 = arith.mulf %64, %65 : vector<16x128xf32>
    %cst_43 = arith.constant dense<0.000000e+00> : vector<16xf32>
    %67 = vector.multi_reduction <add>, %66, %cst_43 [1] : vector<16x128xf32> to vector<16xf32>
    %68 = vector.shape_cast %67 : vector<16xf32> to vector<16x1xf32>
    %cst_44 = arith.constant dense<0.000000e+00> : vector<1x128xf32>
    %69 = tpu.matmul %52, %59, %cst_44 {dimension_numbers = #tpu.dot_dimension_numbers<[1], [1], [0], [0], [0, 0, 1, 0], [], []>} : vector<1x128xf32>, vector<128x128xf32>, vector<1x128xf32> -> vector<1x128xf32>
    %70 = vector.broadcast %68 : vector<16x1xf32> to vector<16x128xf32>
    %71 = vector.broadcast %69 : vector<1x128xf32> to vector<16x128xf32>
    %72 = arith.addf %70, %71 : vector<16x128xf32>
    %cst_45 = arith.constant 0.000000e+00 : f32
    %73 = vector.broadcast %cst_45 : f32 to vector<16x128xf32>
    %74 = arith.cmpf oge, %72, %73 : vector<16x128xf32>
    %cst_46 = arith.constant 2.000000e-01 : f32
    %75 = vector.broadcast %cst_46 : f32 to vector<16x128xf32>
    %76 = arith.mulf %75, %72 : vector<16x128xf32>
    %77 = arith.select %74, %72, %76 : vector<16x128xi1>, vector<16x128xf32>
    %c1_47 = arith.constant 1 : index
    %c0_48 = arith.constant 0 : index
    %c0_49 = arith.constant 0 : index
    %78 = vector.load %arg3[%c1_47, %c0_48, %c0_49] : memref<2x16x128xf32, #tpu.memory_space<vmem>>, vector<1x16x128xf32>
    %79 = vector.shape_cast %78 : vector<1x16x128xf32> to vector<16x128xf32>
    %cst_50 = arith.constant 0.000000e+00 : f32
    %80 = vector.broadcast %cst_50 : f32 to vector<16x128xf32>
    %81 = arith.cmpf ogt, %79, %80 : vector<16x128xf32>
    %cst_51 = arith.constant -1.000000e+30 : f32
    %82 = vector.broadcast %cst_51 : f32 to vector<16x128xf32>
    %83 = arith.select %81, %77, %82 : vector<16x128xi1>, vector<16x128xf32>
    %cst_52 = arith.constant dense<0xFF800000> : vector<16xf32>
    %84 = vector.multi_reduction <maximumf>, %83, %cst_52 [1] : vector<16x128xf32> to vector<16xf32>
    %85 = vector.shape_cast %84 : vector<16xf32> to vector<16x1xf32>
    %86 = vector.broadcast %85 : vector<16x1xf32> to vector<16x128xf32>
    %87 = arith.subf %83, %86 : vector<16x128xf32>
    %88 = math.exp %87 : vector<16x128xf32>
    %89 = arith.mulf %88, %79 : vector<16x128xf32>
    %cst_53 = arith.constant dense<0.000000e+00> : vector<16xf32>
    %90 = vector.multi_reduction <add>, %89, %cst_53 [1] : vector<16x128xf32> to vector<16xf32>
    %91 = vector.shape_cast %90 : vector<16xf32> to vector<16x1xf32>
    %cst_54 = arith.constant 1.000000e+00 : f32
    %92 = vector.broadcast %cst_54 : f32 to vector<16x1xf32>
    %93 = arith.maximumf %91, %92 : vector<16x1xf32>
    %94 = tpu.reciprocal %93 {approx = true} : vector<16x1xf32> -> vector<16x1xf32>
    %95 = vector.broadcast %94 : vector<16x1xf32> to vector<16x128xf32>
    %96 = arith.mulf %89, %95 : vector<16x128xf32>
    %cst_55 = arith.constant dense<0.000000e+00> : vector<16x128xf32>
    %97 = tpu.matmul %96, %59, %cst_55 {dimension_numbers = #tpu.dot_dimension_numbers<[1], [0], [0], [1], [0, 0, 1, 1], [], []>} : vector<16x128xf32>, vector<128x128xf32>, vector<16x128xf32> -> vector<16x128xf32>
    %98 = vector.broadcast %54 : vector<1x128xf32> to vector<16x128xf32>
    %99 = arith.addf %97, %98 : vector<16x128xf32>
    %cst_56 = arith.constant 0.000000e+00 : f32
    %100 = vector.broadcast %cst_56 : f32 to vector<16x128xf32>
    %101 = arith.maximumf %99, %100 : vector<16x128xf32>
    %c1_57 = arith.constant 1 : index
    %c0_58 = arith.constant 0 : index
    %c0_59 = arith.constant 0 : index
    %102 = vector.load %arg8[%c1_57, %c0_58, %c0_59] : memref<2x16x128xf32, #tpu.memory_space<vmem>>, vector<1x16x128xf32>
    %103 = vector.shape_cast %102 : vector<1x16x128xf32> to vector<16x128xf32>
    %104 = vector.shape_cast %101 : vector<16x128xf32> to vector<1x16x128xf32>
    tpu.vector_store %arg8[%c1_57, %c0_58, %c0_59], %104 {strides = array<i32>} : memref<2x16x128xf32, #tpu.memory_space<vmem>>, vector<1x16x128xf32>,
    %105 = vector.extract_strided_slice %0 {offsets = [6, 0], sizes = [1, 128], strides = [1, 1]} : vector<16x128xf32> to vector<1x128xf32>
    %106 = vector.extract_strided_slice %0 {offsets = [7, 0], sizes = [1, 128], strides = [1, 1]} : vector<16x128xf32> to vector<1x128xf32>
    %107 = vector.extract_strided_slice %0 {offsets = [8, 0], sizes = [1, 128], strides = [1, 1]} : vector<16x128xf32> to vector<1x128xf32>
    %cst_60 = arith.constant dense<0.000000e+00> : vector<16x128xf32>
    %108 = tpu.matmul %51, %1, %cst_60 {dimension_numbers = #tpu.dot_dimension_numbers<[1], [0], [0], [1], [0, 0, 1, 1], [], []>} : vector<16x128xf32>, vector<128x128xbf16>, vector<16x128xf32> -> vector<16x128xf32>
    %109 = vector.broadcast %105 : vector<1x128xf32> to vector<16x128xf32>
    %110 = arith.addf %108, %109 : vector<16x128xf32>
    %cst_61 = arith.constant 0.000000e+00 : f32
    %111 = vector.broadcast %cst_61 : f32 to vector<16x128xf32>
    %112 = arith.maximumf %110, %111 : vector<16x128xf32>
    %cst_62 = arith.constant dense<0.000000e+00> : vector<16x128xf32>
    %113 = tpu.matmul %112, %1, %cst_62 {dimension_numbers = #tpu.dot_dimension_numbers<[1], [0], [0], [1], [0, 0, 1, 1], [], []>} : vector<16x128xf32>, vector<128x128xbf16>, vector<16x128xf32> -> vector<16x128xf32>
    %114 = vector.broadcast %106 : vector<1x128xf32> to vector<16x128xf32>
    %115 = arith.addf %113, %114 : vector<16x128xf32>
    %cst_63 = arith.constant 0.000000e+00 : f32
    %116 = vector.broadcast %cst_63 : f32 to vector<16x128xf32>
    %117 = arith.maximumf %115, %116 : vector<16x128xf32>
    %cst_64 = arith.constant dense<0.000000e+00> : vector<16x128xf32>
    %118 = tpu.matmul %117, %1, %cst_64 {dimension_numbers = #tpu.dot_dimension_numbers<[1], [0], [0], [1], [0, 0, 1, 1], [], []>} : vector<16x128xf32>, vector<128x128xbf16>, vector<16x128xf32> -> vector<16x128xf32>
    %119 = vector.broadcast %107 : vector<1x128xf32> to vector<16x128xf32>
    %120 = arith.addf %118, %119 : vector<16x128xf32>
    %cst_65 = arith.constant 0.000000e+00 : f32
    %121 = vector.broadcast %cst_65 : f32 to vector<16x128xf32>
    %122 = arith.subf %121, %120 : vector<16x128xf32>
    %123 = math.exp %122 : vector<16x128xf32>
    %cst_66 = arith.constant 1.000000e+00 : f32
    %124 = vector.broadcast %cst_66 : f32 to vector<16x128xf32>
    %125 = arith.addf %124, %123 : vector<16x128xf32>
    %126 = tpu.reciprocal %125 {approx = true} : vector<16x128xf32> -> vector<16x128xf32>
    %c0_67 = arith.constant 0 : index
    %c0_68 = arith.constant 0 : index
    %c0_69 = arith.constant 0 : index
    %127 = vector.load %arg8[%c0_67, %c0_68, %c0_69] : memref<2x16x128xf32, #tpu.memory_space<vmem>>, vector<1x16x128xf32>
    %128 = vector.shape_cast %127 : vector<1x16x128xf32> to vector<16x128xf32>
    %129 = vector.shape_cast %126 : vector<16x128xf32> to vector<1x16x128xf32>
    tpu.vector_store %arg8[%c0_67, %c0_68, %c0_69], %129 {strides = array<i32>} : memref<2x16x128xf32, #tpu.memory_space<vmem>>, vector<1x16x128xf32>,
    return
  }
  func.func @transform_0(%arg0: i32) -> (i32, i32, i32) {
    %c0_i32 = arith.constant 0 : i32
    %c0_i32_0 = arith.constant 0 : i32
    %c0_i32_1 = arith.constant 0 : i32
    %c0_i32_2 = arith.constant 0 : i32
    return %c0_i32, %c0_i32_0, %c0_i32_1 : i32, i32, i32
  }
  func.func @transform_1(%arg0: i32) -> (i32, i32, i32) {
    %c0_i32 = arith.constant 0 : i32
    %c0_i32_0 = arith.constant 0 : i32
    %c0_i32_1 = arith.constant 0 : i32
    %c0_i32_2 = arith.constant 0 : i32
    return %c0_i32, %c0_i32_0, %c0_i32_1 : i32, i32, i32
  }
  func.func @transform_2(%arg0: i32) -> (i32, i32, i32) {
    %c0_i32 = arith.constant 0 : i32
    %c0_i32_0 = arith.constant 0 : i32
    %c0_i32_1 = arith.constant 0 : i32
    %c0_i32_2 = arith.constant 0 : i32
    return %c0_i32, %c0_i32_0, %c0_i32_1 : i32, i32, i32
  }
  func.func @transform_3(%arg0: i32) -> (i32, i32, i32) {
    %c0_i32 = arith.constant 0 : i32
    %c0_i32_0 = arith.constant 0 : i32
    %c0_i32_1 = arith.constant 0 : i32
    %c0_i32_2 = arith.constant 0 : i32
    return %c0_i32, %c0_i32_0, %c0_i32_1 : i32, i32, i32
  }
  func.func @transform_4(%arg0: i32) -> (i32, i32, i32) {
    %c0_i32 = arith.constant 0 : i32
    %c0_i32_0 = arith.constant 0 : i32
    %c0_i32_1 = arith.constant 0 : i32
    %c0_i32_2 = arith.constant 0 : i32
    return %c0_i32, %c0_i32_0, %c0_i32_1 : i32, i32, i32
  }
  func.func @transform_5(%arg0: i32) -> (i32, i32) {
    %c0_i32 = arith.constant 0 : i32
    %c0_i32_0 = arith.constant 0 : i32
    %c0_i32_1 = arith.constant 0 : i32
    return %c0_i32, %c0_i32_0 : i32, i32
  }
  func.func @transform_6(%arg0: i32) -> (i32, i32) {
    %c0_i32 = arith.constant 0 : i32
    %c0_i32_0 = arith.constant 0 : i32
    %c0_i32_1 = arith.constant 0 : i32
    return %c0_i32, %c0_i32_0 : i32, i32
  }
  func.func @transform_7(%arg0: i32) -> (i32, i32, i32) {
    %c0_i32 = arith.constant 0 : i32
    %c0_i32_0 = arith.constant 0 : i32
    %c0_i32_1 = arith.constant 0 : i32
    %c0_i32_2 = arith.constant 0 : i32
    return %c0_i32, %c0_i32_0, %c0_i32_1 : i32, i32, i32
  }
}

</mosaic_0001>

<bundles_post_ra>
// kernel: _forward.1
= control target key start
LH: loop header
LB: loop body
LE: loop exit
PB: predicated region body
PF: predicated region fallthrough
CT: control target
= control target key end

     0   :  { %12 = vsyncpa [#allocation3], 0  ;;  %s1680_s0 = inlined_call_operand.hbm [shape: bf16[2,128,128], index: 0, kind: input, shape index: {}]   ;;  %s1681_s1 = inlined_call_operand.hbm [shape: bf16[2,16,128], index: 1, kind: input, shape index: {}]   ;;  %s1682_s2 = inlined_call_operand.hbm [shape: f32[2,16,128], index: 2, kind: input, shape index: {}]   ;;  %s1683_s3 = inlined_call_operand.hbm [shape: bf16[2,128,128], index: 3, kind: input, shape index: {}]   ;;  %s1684_s4 = inlined_call_operand.hbm [shape: bf16[2,128,128], index: 4, kind: input, shape index: {}]   ;;  %s1685_s5 = inlined_call_operand.hbm [shape: f32[16,128], index: 5, kind: input, shape index: {}]   ;;  %s1686_s6 = inlined_call_operand.hbm [shape: bf16[128,128], index: 6, kind: input, shape index: {}]   ;;  %s1687_s7 = inlined_call_operand.vmem [shape: f32[2,16,128], index: 7, kind: output, shape index: {}]  }
   0x1   :  { %13 = vsyncpa [#allocation5], 0 }
   0x2   :  { %14 = vsyncpa [#allocation8], 0 }
   0x3   :  { %15 = vsyncpa [#allocation11], 0  ;;  %s33_s26 = sshll.u32 %s1681_s1, 4  ;;  %s1501_s27 = smov [#allocation4]   ;;  %s34_s26 = int_to_ptr.hbm [resolvable:$true] %s33_s26 }
   0x4   :  { %s35_s28 = sshll.u32 %s1501_s27, 4  ;;  %s59_s8 = sshll.u32 %s1683_s3, 4  ;;  %s36_s28 = int_to_ptr.vmem [resolvable:$true] %s35_s28  ;;  %s60_s8 = int_to_ptr.hbm [resolvable:$true] %s59_s8 }
   0x5   :  { %s1502_s9 = smov 64   ;;  %s1503_s10 = smov 4  }
   0x6   :  { %41 = dma.hbm_to_vmem [thread:$0]  %s34_s26, 256, %s36_s28, [#allocation5], %s1502_s9, %s1502_s9, %s1503_s10  }
   0x7   :  { %s1504_s11 = smov [#allocation7]   ;;  %s85_s14 = sshll.u32 %s1685_s5, 4  ;;  %s86_s14 = int_to_ptr.hbm [resolvable:$true] %s85_s14 }
   0x8   :  { %s61_s12 = sshll.u32 %s1504_s11, 4  ;;  %s1505_s3 = smov [#allocation10]   ;;  %s62_s12 = int_to_ptr.vmem [resolvable:$true] %s61_s12 }
   0x9   :  { %67 = dma.hbm_to_vmem [thread:$0]  %s60_s8, 2048, %s62_s12, [#allocation8], %s1502_s9, %s1502_s9, %s1503_s10  }
   0xa   :  { %s87_s15 = sshll.u32 %s1505_s3, 4  ;;  %s20_s18 = sshll.u32 %s1680_s0, 4  ;;  %s88_s15 = int_to_ptr.vmem [resolvable:$true] %s87_s15  ;;  %s21_s18 = int_to_ptr.hbm [resolvable:$true] %s20_s18 }
   0xb   :  { %s1506_s19 = smov 128   ;;  %s1507_s20 = smov 8  }
   0xc   :  { %93 = dma.hbm_to_vmem [thread:$0]  %s86_s14, 256, %s88_s15, [#allocation11], %s1506_s19, %s1506_s19, %s1507_s20  }
   0xd   :  { %s1508_s21 = smov [#allocation2]   ;;  %s46_s25 = sshll.u32 %s1682_s2, 4  ;;  %s47_s25 = int_to_ptr.hbm [resolvable:$true] %s46_s25 }
   0xe   :  { %s22_s22 = sshll.u32 %s1508_s21, 4  ;;  %s72_s0 = sshll.u32 %s1684_s4, 4  ;;  %s23_s22 = int_to_ptr.vmem [resolvable:$true] %s22_s22  ;;  %s73_s0 = int_to_ptr.hbm [resolvable:$true] %s72_s0 }
   0xf   :  { %28 = dma.hbm_to_vmem [thread:$0]  %s21_s18, 2048, %s23_s22, [#allocation3], %s1502_s9, %s1502_s9, %s1503_s10  }
  0x10   :  { %s1509_s27 = smov [#allocation6]   ;;  %s1510_s29 = smov [#allocation9]  }
  0x11   :  { %s48_s28 = sshll.u32 %s1509_s27, 4  ;;  %s74_s30 = sshll.u32 %s1510_s29, 4  ;;  %s49_s28 = int_to_ptr.vmem [resolvable:$true] %s48_s28  ;;  %s75_s30 = int_to_ptr.vmem [resolvable:$true] %s74_s30 }
  0x12   :  { %54 = dma.hbm_to_vmem [thread:$0]  %s47_s25, 512, %s49_s28, [#allocation5], %s1506_s19, %s1506_s19, %s1507_s20  }
  0x13   :  { %s98_s2 = sshll.u32 %s1686_s6, 4  ;;  %s1511_s12 = smov [#allocation12]   ;;  %s99_s2 = int_to_ptr.hbm [resolvable:$true] %s98_s2 }
  0x14   :  { %80 = dma.hbm_to_vmem [thread:$0]  %s73_s0, 2048, %s75_s30, [#allocation8], %s1502_s9, %s1502_s9, %s1503_s10  }
  0x15   :  { %s100_s1 = sshll.u32 %s1511_s12, 4  ;;  %s101_s1 = int_to_ptr.vmem [resolvable:$true] %s100_s1 }
  0x16   :  { %106 = dma.hbm_to_vmem [thread:$0]  %s99_s2, 1024, %s101_s1, [#allocation11], %s1502_s9, %s1502_s9, %s1503_s10  }
  0x17   :  { %1493 = dma.done.wait [#allocation3], 2048  }
  0x18   :  { %1494 = vsyncadd [#allocation3], 4294965248 }
  0x19   :  { %1495 = dma.done.wait [#allocation5], 768  }
  0x1a   :  { %1496 = vsyncadd [#allocation5], 4294966528 }
  0x1b   :  { %1497 = dma.done.wait [#allocation8], 4096  }
  0x1c   :  { %1498 = vsyncadd [#allocation8], 4294963200 }
  0x1d   :  { %1499 = dma.done.wait [#allocation11], 1280  }
  0x1e   :  { %1500 = vsyncadd [#allocation11], 4294966016  ;;  %v1247_v0 = vld [vmem:[#allocation7 + $0x38] sm:$0xff]  ;;  %v1246_v1 = vld [vmem:[#allocation7 + $0x30] sm:$0xff] }
  0x1f   :  { %281 = vmatpush.bf16.msra.mxu0 %v1247_v0  ;;  %v1245_v2 = vld [vmem:[#allocation7 + $0x28] sm:$0xff]  ;;  %v1244_v3 = vld [vmem:[#allocation7 + $0x20] sm:$0xff]  ;;  %v1243_v4 = vld [vmem:[#allocation7 + $0x18] sm:$0xff] }
  0x20   :  { %v1242_v5 = vld [vmem:[#allocation7 + $0x10] sm:$0xff]  ;;  %v1241_v6 = vld [vmem:[#allocation7 + $0x8] sm:$0xff]  ;;  %v1240_v7 = vld [vmem:[#allocation7] sm:$0xff] }
  0x21   :  { %v1232_v8 = vld [vmem:[#allocation2] sm:$0xff]  ;;  %v1233_v9 = vld [vmem:[#allocation2 + $0x8] sm:$0xff]  ;;  %v1234_v10 = vld [vmem:[#allocation2 + $0x10] sm:$0xff] }
  0x22   :  { %v1235_v11 = vld [vmem:[#allocation2 + $0x18] sm:$0xff]  ;;  %v1236_v12 = vld [vmem:[#allocation2 + $0x20] sm:$0xff]  ;;  %v1237_v13 = vld [vmem:[#allocation2 + $0x28] sm:$0xff] }
  0x23   :  { %282 = vmatpush.bf16.msra.mxu0 %v1246_v1  ;;  %v1238_v14 = vld [vmem:[#allocation2 + $0x30] sm:$0xff]  ;;  %v1239_v15 = vld [vmem:[#allocation2 + $0x38] sm:$0xff]  ;;  %v1256_v16 = vld [vmem:[#allocation9 + $0x38] sm:$0xff] }
  0x24   :  { %402 = vmatpush.bf16.msra.mxu3 %v1256_v16  ;;  %v1255_v17 = vld [vmem:[#allocation9 + $0x30] sm:$0xff]  ;;  %v1254_v19 = vld [vmem:[#allocation9 + $0x28] sm:$0xff]  ;;  %v1253_v20 = vld [vmem:[#allocation9 + $0x20] sm:$0xff] }
  0x25   :  { %v1252_v22 = vld [vmem:[#allocation9 + $0x18] sm:$0xff]  ;;  %v1251_v23 = vld [vmem:[#allocation9 + $0x10] sm:$0xff]  ;;  %v1250_v25 = vld [vmem:[#allocation9 + $0x8] sm:$0xff] }
  0x26   :  { %v1249_v26 = vld [vmem:[#allocation9] sm:$0xff]  ;;  %v1248_v28 = vld [vmem:[#allocation4] sm:$0xff]  ;;  %v1272_v41 = vld [vmem:[#allocation7 + $0x78] sm:$0xff] }
  0x27   :  { %283 = vmatpush.bf16.msra.mxu0 %v1245_v2  ;;  %636 = vmatpush.bf16.msra.mxu1 %v1272_v41  ;;  %v1271_v42 = vld [vmem:[#allocation7 + $0x70] sm:$0xff]  ;;  %v1597_v43 = vld [vmem:[#allocation10] sm:$0xff]  ;;  %v1270_v45 = vld [vmem:[#allocation7 + $0x68] sm:$0xff] }
  0x28   :  { %403 = vmatpush.bf16.msra.mxu3 %v1255_v17  ;;  %v416_v44 = vperm.slane %v1597_v43, 1  ;;  %v1269_v48 = vld [vmem:[#allocation7 + $0x60] sm:$0xff]  ;;  %v1268_v49 = vld [vmem:[#allocation7 + $0x58] sm:$0xff]  ;;  %v1267_v52 = vld [vmem:[#allocation7 + $0x50] sm:$0xff] }
  0x29   :  { %v1266_v53 = vld [vmem:[#allocation7 + $0x48] sm:$0xff]  ;;  %v1265_v54 = vld [vmem:[#allocation7 + $0x40] sm:$0xff]  ;;  %v1257_v55 = vld [vmem:[#allocation2 + $0x40] sm:$0xff] }
  0x2a   :  { %v1258_v56 = vld [vmem:[#allocation2 + $0x48] sm:$0xff]  ;;  %v1259_v57 = vld [vmem:[#allocation2 + $0x50] sm:$0xff]  ;;  %v1260_v58 = vld [vmem:[#allocation2 + $0x58] sm:$0xff] }
  0x2b   :  { %284 = vmatpush.bf16.msra.mxu0 %v1244_v3  ;;  %637 = vmatpush.bf16.msra.mxu1 %v1271_v42  ;;  %v1261_v59 = vld [vmem:[#allocation2 + $0x60] sm:$0xff]  ;;  %v1262_v60 = vld [vmem:[#allocation2 + $0x68] sm:$0xff]  ;;  %v1263_v61 = vld [vmem:[#allocation2 + $0x70] sm:$0xff] }
  0x2c   :  { %404 = vmatpush.bf16.msra.mxu3 %v1254_v19  ;;  %v1264_v62 = vld [vmem:[#allocation2 + $0x78] sm:$0xff]  ;;  %v1278_v42 = vld [vmem:[#allocation9 + $0x60] sm:$0xff] }
  0x2d   :  { %v1279_v41 = vld [vmem:[#allocation9 + $0x68] sm:$0xff] }
  0x2f   :  { %285 = vmatpush.bf16.msra.mxu0 %v1243_v4  ;;  %638 = vmatpush.bf16.msra.mxu1 %v1270_v45  ;;  %v452_v4 = vld [vmem:[#allocation6] sm:$0xff]  ;;  %v1276_v45 = vld [vmem:[#allocation9 + $0x50] sm:$0xff] }
  0x30   :  { %405 = vmatpush.bf16.msra.mxu3 %v1253_v20  ;;  %vm454_vm1 = vcmp.gt.f32.partialorder %v452_v4, 0.0 }
  0x33   :  { %286 = vmatpush.bf16.msra.mxu0 %v1242_v5  ;;  %639 = vmatpush.bf16.msra.mxu1 %v1269_v48 }
  0x34   :  { %406 = vmatpush.bf16.msra.mxu3 %v1252_v22 }
  0x37   :  { %287 = vmatpush.bf16.msra.mxu0 %v1241_v6  ;;  %640 = vmatpush.bf16.msra.mxu1 %v1268_v49 }
  0x38   :  { %407 = vmatpush.bf16.msra.mxu3 %v1251_v23 }
  0x3b   :  { %288 = vmatpush.bf16.msra.mxu0 %v1240_v7  ;;  %641 = vmatpush.bf16.msra.mxu1 %v1267_v52 }
  0x3c   :  { %408 = vmatpush.bf16.msra.mxu3 %v1250_v25 }
  0x3e   :  { %289 = vmatmul.bf16.vlgmr.msra.gmra.mxu0 %v1232_v8 }
  0x3f   :  { %642 = vmatpush.bf16.msra.mxu1 %v1266_v53 }
  0x40   :  { %409 = vmatpush.bf16.msra.mxu3 %v1249_v26 }
  0x43   :  { %410 = vmatmul.bf16.vlgmr.msra.gmra.mxu3 %v1248_v28  ;;  %643 = vmatpush.bf16.msra.mxu1 %v1265_v54 }
  0x46   :  { %644 = vmatmul.bf16.vlgmr.msra.gmra.mxu1 %v1257_v55 }
  0x4e   :  { %294 = vmatmul.bf16.gmra.mxu0 %v1233_v9 }
  0x56   :  { %649 = vmatmul.bf16.gmra.mxu1 %v1258_v56  ;;  %v1273_v56 = vld [vmem:[#allocation4 + $0x8] sm:$0xff] }
  0x5e   :  { %299 = vmatmul.bf16.gmra.mxu0 %v1234_v10 }
  0x66   :  { %654 = vmatmul.bf16.gmra.mxu1 %v1259_v57  ;;  %v781_v57 = vrot.slane %v1597_v43, 3 }
  0x6e   :  { %304 = vmatmul.bf16.gmra.mxu0 %v1235_v11 }
  0x76   :  { %659 = vmatmul.bf16.gmra.mxu1 %v1260_v58 }
  0x7e   :  { %309 = vmatmul.bf16.gmra.mxu0 %v1236_v12  ;;  %v453_v12 = vld [vmem:[#allocation6 + $0x8] sm:$0xff] }
  0x7f   :  { %vm455_vm3 = vcmp.gt.f32.partialorder %v453_v12, 0.0 }
  0x86   :  { %664 = vmatmul.bf16.gmra.mxu1 %v1261_v59 }
  0x8e   :  { %314 = vmatmul.bf16.gmra.mxu0 %v1237_v13 }
  0x96   :  { %669 = vmatmul.bf16.gmra.mxu1 %v1262_v60  ;;  %v773_v60 = vperm.slane %v1597_v43, 4 }
  0x9e   :  { %319 = vmatmul.bf16.gmra.mxu0 %v1238_v14 }
  0xa6   :  { %674 = vmatmul.bf16.gmra.mxu1 %v1263_v61 }
  0xae   :  { %324 = vmatmul.bf16.gmra.mxu0 %v1239_v15 }
  0xb6   :  { %679 = vmatmul.bf16.gmra.mxu1 %v1264_v62 }
  0xbb   :  { %v1588_v18 = vpop.f32.mrf.mxu0 }
  0xc3   :  { %v1590_v21 = vpop.f32.mrf.mxu0  ;;  %v1604_v0 = vpop.f32.mrf.mxu1 }
  0xc6   :  { %v411_v46 = vpop.f32.mrf.mxu3 }
  0xc7   :  { %v417_v47 = vmul.f32 %v416_v44, %v411_v46  ;;  %v1275_v46 = vld [vmem:[#allocation9 + $0x48] sm:$0xff] }
  0xc9   :  { %419 = vadd.xlane.f32.xlu0 %v417_v47  ;;  %v1274_v47 = vld [vmem:[#allocation9 + $0x40] sm:$0xff] }
  0xcb   :  { %v1592_v24 = vpop.f32.mrf.mxu0  ;;  %v1606_v6 = vpop.f32.mrf.mxu1 }
  0xce   :  { %v413_v50 = vpop.f32.mrf.mxu3 }
  0xcf   :  { %v418_v51 = vmul.f32 %v416_v44, %v413_v50  ;;  %v1277_v44 = vld [vmem:[#allocation9 + $0x58] sm:$0xff] }
  0xd1   :  { %421 = vadd.xlane.f32.xlu0 %v418_v51 }
  0xd3   :  { %v297_v27 = vpop.f32.mrf.mxu0  ;;  %v1608_v13 = vpop.f32.mrf.mxu1 }
  0xdb   :  { %v300_v29 = vpop.f32.mrf.mxu0  ;;  %v1610_v16 = vpop.f32.mrf.mxu1 }
  0xe3   :  { %v302_v30 = vpop.f32.mrf.mxu0  ;;  %v1612_v17 = vpop.f32.mrf.mxu1 }
  0xeb   :  { %v305_v31 = vpop.f32.mrf.mxu0 }
  0xf3   :  { %v307_v32 = vpop.f32.mrf.mxu0 }
  0xfb   :  { %v310_v33 = vpop.f32.mrf.mxu0 }
 0x103   :  { %v312_v34 = vpop.f32.mrf.mxu0 }
 0x10b   :  { %v315_v35 = vpop.f32.mrf.mxu0 }
 0x113   :  { %v317_v36 = vpop.f32.mrf.mxu0 }
 0x11b   :  { %v320_v37 = vpop.f32.mrf.mxu0 }
 0x123   :  { %v322_v38 = vpop.f32.mrf.mxu0 }
 0x12b   :  { %v325_v39 = vpop.f32.mrf.mxu0 }
 0x133   :  { %v327_v40 = vpop.f32.mrf.mxu0 }
 0x134   :  { %423 = vmatpush.xpose.msra.mxu2 %v327_v40  ;;  %481 = vmatpush.msrb.mxu3 %v327_v40  ;;  %v1280_v40 = vld [vmem:[#allocation9 + $0x70] sm:$0xff] }
 0x136   :  { %482 = vmatpush.msrb.mxu3 %v325_v39 }
 0x138   :  { %424 = vmatpush.xpose.msra.mxu2 %v325_v39  ;;  %483 = vmatpush.msrb.mxu3 %v322_v38  ;;  %v1281_v39 = vld [vmem:[#allocation9 + $0x78] sm:$0xff] }
 0x13a   :  { %484 = vmatpush.msrb.mxu3 %v320_v37 }
 0x13c   :  { %425 = vmatpush.xpose.msra.mxu2 %v322_v38  ;;  %485 = vmatpush.msrb.mxu3 %v317_v36  ;;  %v420_v63 = vpop.xlane.xlu0 %419 }
 0x13e   :  { %486 = vmatpush.msrb.mxu3 %v315_v35 }
 0x140   :  { %426 = vmatpush.xpose.msra.mxu2 %v320_v37  ;;  %487 = vmatpush.msrb.mxu3 %v312_v34 }
 0x142   :  { %488 = vmatpush.msrb.mxu3 %v310_v33 }
 0x144   :  { %427 = vmatpush.xpose.msra.mxu2 %v317_v36  ;;  %489 = vmatpush.msrb.mxu3 %v307_v32  ;;  %v422_v3 = vpop.xlane.xlu0 %421 }
 0x146   :  { %490 = vmatpush.msrb.mxu3 %v305_v31 }
 0x148   :  { %428 = vmatpush.xpose.msra.mxu2 %v315_v35  ;;  %491 = vmatpush.msrb.mxu3 %v302_v30 }
 0x14a   :  { %492 = vmatpush.msrb.mxu3 %v300_v29 }
 0x14c   :  { %429 = vmatpush.xpose.msra.mxu2 %v312_v34  ;;  %493 = vmatpush.msrb.mxu3 %v297_v27 }
 0x14e   :  { %494 = vmatpush.msrb.mxu3 %v1592_v24 }
 0x150   :  { %430 = vmatpush.xpose.msra.mxu2 %v310_v33  ;;  %495 = vmatpush.msrb.mxu3 %v1590_v21 }
 0x152   :  { %496 = vmatpush.msrb.mxu3 %v1588_v18 }
 0x154   :  { %431 = vmatpush.xpose.msra.mxu2 %v307_v32  ;;  %759 = vmatpush.bf16.msra.mxu3 %v1281_v39 }
 0x158   :  { %432 = vmatpush.xpose.msra.mxu2 %v305_v31  ;;  %760 = vmatpush.bf16.msra.mxu3 %v1280_v40  ;;  %v480_v40 = vperm.slane %v1597_v43, 2 }
 0x15c   :  { %433 = vmatpush.xpose.msra.mxu2 %v302_v30  ;;  %761 = vmatpush.bf16.msra.mxu3 %v1279_v41 }
 0x160   :  { %434 = vmatpush.xpose.msra.mxu2 %v300_v29  ;;  %762 = vmatpush.bf16.msra.mxu3 %v1278_v42 }
 0x164   :  { %435 = vmatpush.xpose.msra.mxu2 %v297_v27  ;;  %763 = vmatpush.bf16.msra.mxu3 %v1277_v44 }
 0x168   :  { %436 = vmatpush.xpose.msra.mxu2 %v1592_v24  ;;  %764 = vmatpush.bf16.msra.mxu3 %v1276_v45 }
 0x16c   :  { %437 = vmatpush.xpose.msra.mxu2 %v1590_v21  ;;  %765 = vmatpush.bf16.msra.mxu3 %v1275_v46 }
 0x170   :  { %438 = vmatpush.xpose.msra.mxu2 %v1588_v18  ;;  %v1614_v18 = vpop.f32.mrf.mxu1  ;;  %766 = vmatpush.bf16.msra.mxu3 %v1274_v47  ;;  %v841_v47 = vperm.slane %v1597_v43, 5 }
 0x173   :  { %439 = vmatmul.f32.vlgmr.msra.gmra.mxu2 %v1597_v43 }
 0x178   :  { %v1616_v19 = vpop.f32.mrf.mxu1 }
 0x180   :  { %v1618_v20 = vpop.f32.mrf.mxu1 }
 0x188   :  { %v1620_v21 = vpop.f32.mrf.mxu1 }
 0x190   :  { %v1622_v22 = vpop.f32.mrf.mxu1 }
 0x198   :  { %v1624_v23 = vpop.f32.mrf.mxu1 }
 0x1a0   :  { %v1626_v24 = vpop.f32.mrf.mxu1 }
 0x1a8   :  { %v1628_v25 = vpop.f32.mrf.mxu1 }
 0x1b0   :  { %v677_v26 = vpop.f32.mrf.mxu1 }
 0x1b8   :  { %v680_v27 = vpop.f32.mrf.mxu1 }
 0x1c0   :  { %v682_v28 = vpop.f32.mrf.mxu1 }
 0x1c1   :  { %783 = vmatpush.xpose.msrb.mxu2 %v682_v28 }
 0x1c5   :  { %784 = vmatpush.xpose.msrb.mxu2 %v680_v27 }
 0x1c9   :  { %785 = vmatpush.xpose.msrb.mxu2 %v677_v26 }
 0x1cd   :  { %786 = vmatpush.xpose.msrb.mxu2 %v1628_v25 }
 0x1d1   :  { %787 = vmatpush.xpose.msrb.mxu2 %v1626_v24 }
 0x1d5   :  { %788 = vmatpush.xpose.msrb.mxu2 %v1624_v23 }
 0x1d9   :  { %789 = vmatpush.xpose.msrb.mxu2 %v1622_v22 }
 0x1dd   :  { %790 = vmatpush.xpose.msrb.mxu2 %v1620_v21 }
 0x1e1   :  { %791 = vmatpush.xpose.msrb.mxu2 %v1618_v20 }
 0x1e5   :  { %792 = vmatpush.xpose.msrb.mxu2 %v1616_v19 }
 0x1e9   :  { %793 = vmatpush.xpose.msrb.mxu2 %v1614_v18 }
 0x1ed   :  { %794 = vmatpush.xpose.msrb.mxu2 %v1612_v17 }
 0x1f1   :  { %795 = vmatpush.xpose.msrb.mxu2 %v1610_v16 }
 0x1f5   :  { %796 = vmatpush.xpose.msrb.mxu2 %v1608_v13 }
 0x1f6   :  { %v440_v1 = vpop.f32.mrf.mxu2 }
 0x1f7   :  { %v443_v2 = vperm.slane %v440_v1, 0 }
 0x1f9   :  { %v444_v5 = vadd.f32 %v443_v2, %v420_v63  ;;  %v445_v7 = vadd.f32 %v443_v2, %v422_v3  ;;  %797 = vmatpush.xpose.msrb.mxu2 %v1606_v6 }
 0x1fb   :  { %vm446_vm0 = vcmp.ge.f32.partialorder %v444_v5, 0.0  ;;  %v448_v8 = vmul.f32 0.2, %v444_v5  ;;  %v449_v11 = vmul.f32 0.2, %v445_v7  ;;  %vm447_vm2 = vcmp.ge.f32.partialorder %v445_v7, 0.0 }
 0x1fd   :  { %v450_v9 = vsel %vm446_vm0, %v444_v5, %v448_v8  ;;  %v451_v14 = vsel %vm447_vm2, %v445_v7, %v449_v11  ;;  %798 = vmatpush.xpose.msrb.mxu2 %v1604_v0  ;;  %v813_v5 = vld [vmem:[#allocation6 + $0x10] sm:$0xff] }
 0x1fe   :  { %v456_v10 = vsel %vm454_vm1, %v450_v9, -1e+30  ;;  %v457_v15 = vsel %vm455_vm3, %v451_v14, -1e+30  ;;  %vm815_vm5 = vcmp.gt.f32.partialorder %v813_v5, 0.0 }
 0x1ff   :  { %458 = vmax.xlane.f32.xlu1 %v456_v10 }
 0x200   :  { %799 = vmatmul.f32.vlgmr.msrb.gmra.mxu2 %v781_v57 }
 0x207   :  { %460 = vmax.xlane.f32.xlu1 %v457_v15 }
 0x272   :  { %v459_v29 = vpop.xlane.xlu1 %458 }
 0x273   :  { %v462_v30 = vsub.f32 %v456_v10, %v459_v29  ;;  %v814_v10 = vld [vmem:[#allocation6 + $0x18] sm:$0xff]  ;;  %v1227_v29 = vld [vmem:[#allocation12 + $0x18] sm:$0xff] }
 0x274   :  { %vm816_vm7 = vcmp.gt.f32.partialorder %v814_v10, 0.0 }
 0x275   :  { %v464_v31 = vmul.f32 1.442695, %v462_v30  ;;  %v1226_v30 = vld [vmem:[#allocation12 + $0x10] sm:$0xff] }
 0x277   :  { %1301 = vpow2.f32 %v464_v31  ;;  %v1225_v31 = vld [vmem:[#allocation12 + $0x8] sm:$0xff] }
 0x27a   :  { %v461_v32 = vpop.xlane.xlu1 %460 }
 0x27b   :  { %v463_v33 = vsub.f32 %v457_v15, %v461_v32  ;;  %v1231_v15 = vld [vmem:[#allocation12 + $0x38] sm:$0xff]  ;;  %v1224_v32 = vld [vmem:[#allocation12] sm:$0xff] }
 0x27c   :  { %937 = vmatpush.bf16.msrb.mxu0 %v1231_v15  ;;  %1282 = vmatpush.bf16.msrb.mxu1 %v1231_v15 }
 0x27d   :  { %v1302_v34 = vpop.eup %1301  ;;  %v466_v35 = vmul.f32 1.442695, %v463_v33  ;;  %955 = vmatpush.bf16.msra.mxu2 %v1231_v15 }
 0x27e   :  { %v468_v36 = vmul.f32 %v1302_v34, %v452_v4 }
 0x27f   :  { %1303 = vpow2.f32 %v466_v35 }
 0x280   :  { %470 = vadd.xlane.f32.xlu2 %v468_v36 }
 0x283   :  { %v800_v2 = vpop.f32.mrf.mxu2 }
 0x284   :  { %v803_v3 = vperm.slane %v800_v2, 0 }
 0x285   :  { %v1304_v37 = vpop.eup %1303 }
 0x286   :  { %v469_v38 = vmul.f32 %v1304_v37, %v453_v12 }
 0x288   :  { %472 = vadd.xlane.f32.xlu2 %v469_v38 }
 0x2f3   :  { %v471_v48 = vpop.xlane.xlu2 %470 }
 0x2f4   :  { %v474_v49 = vmax.f32 %v471_v48, 1.0 }
 0x2f6   :  { %1305 = vrcp.f32 %v474_v49 }
 0x2fb   :  { %v473_v50 = vpop.xlane.xlu2 %472 }
 0x2fc   :  { %v1306_v51 = vpop.eup %1305  ;;  %v475_v52 = vmax.f32 %v473_v50, 1.0 }
 0x2fd   :  { %v478_v53 = vmul.f32 %v1306_v51, %v468_v36 }
 0x2fe   :  { %1307 = vrcp.f32 %v475_v52 }
 0x2ff   :  { %497 = vmatmul.f32.vlgmr.msrb.gmra.mxu3 %v478_v53 }
 0x300   :  { %842 = vmatpush.msrb.mxu3 %v682_v28  ;;  %v1228_v28 = vld [vmem:[#allocation12 + $0x20] sm:$0xff] }
 0x302   :  { %843 = vmatpush.msrb.mxu3 %v680_v27  ;;  %v1229_v27 = vld [vmem:[#allocation12 + $0x28] sm:$0xff] }
 0x304   :  { %v1308_v54 = vpop.eup %1307  ;;  %844 = vmatpush.msrb.mxu3 %v677_v26  ;;  %v1230_v26 = vld [vmem:[#allocation12 + $0x30] sm:$0xff] }
 0x305   :  { %v479_v55 = vmul.f32 %v1308_v54, %v469_v38  ;;  %938 = vmatpush.bf16.msrb.mxu0 %v1230_v26  ;;  %1283 = vmatpush.bf16.msrb.mxu1 %v1230_v26  ;;  %v870_v54 = vperm.slane %v1597_v43, 6 }
 0x306   :  { %845 = vmatpush.msrb.mxu3 %v1628_v25  ;;  %956 = vmatpush.bf16.msra.mxu2 %v1230_v26 }
 0x307   :  { %500 = vmatmul.f32.gmra.mxu3 %v479_v55 }
 0x308   :  { %846 = vmatpush.msrb.mxu3 %v1626_v24 }
 0x309   :  { %939 = vmatpush.bf16.msrb.mxu0 %v1229_v27  ;;  %1284 = vmatpush.bf16.msrb.mxu1 %v1229_v27 }
 0x30a   :  { %847 = vmatpush.msrb.mxu3 %v1624_v23  ;;  %957 = vmatpush.bf16.msra.mxu2 %v1229_v27 }
 0x30c   :  { %848 = vmatpush.msrb.mxu3 %v1622_v22 }
 0x30d   :  { %940 = vmatpush.bf16.msrb.mxu0 %v1228_v28  ;;  %1285 = vmatpush.bf16.msrb.mxu1 %v1228_v28 }
 0x30e   :  { %849 = vmatpush.msrb.mxu3 %v1620_v21  ;;  %958 = vmatpush.bf16.msra.mxu2 %v1228_v28 }
 0x30f   :  { %767 = vmatmul.bf16.vlgmr.msra.gmra.mxu3 %v1273_v56 }
 0x310   :  { %850 = vmatpush.msrb.mxu3 %v1618_v20 }
 0x311   :  { %941 = vmatpush.bf16.msrb.mxu0 %v1227_v29  ;;  %1286 = vmatpush.bf16.msrb.mxu1 %v1227_v29 }
 0x312   :  { %851 = vmatpush.msrb.mxu3 %v1616_v19  ;;  %959 = vmatpush.bf16.msra.mxu2 %v1227_v29 }
 0x314   :  { %852 = vmatpush.msrb.mxu3 %v1614_v18 }
 0x315   :  { %942 = vmatpush.bf16.msrb.mxu0 %v1226_v30  ;;  %1287 = vmatpush.bf16.msrb.mxu1 %v1226_v30 }
 0x316   :  { %853 = vmatpush.msrb.mxu3 %v1612_v17  ;;  %960 = vmatpush.bf16.msra.mxu2 %v1226_v30 }
 0x318   :  { %854 = vmatpush.msrb.mxu3 %v1610_v16 }
 0x319   :  { %943 = vmatpush.bf16.msrb.mxu0 %v1225_v31  ;;  %1288 = vmatpush.bf16.msrb.mxu1 %v1225_v31 }
 0x31a   :  { %855 = vmatpush.msrb.mxu3 %v1608_v13  ;;  %961 = vmatpush.bf16.msra.mxu2 %v1225_v31 }
 0x31c   :  { %856 = vmatpush.msrb.mxu3 %v1606_v6 }
 0x31d   :  { %944 = vmatpush.bf16.msrb.mxu0 %v1224_v32  ;;  %1289 = vmatpush.bf16.msrb.mxu1 %v1224_v32 }
 0x31e   :  { %857 = vmatpush.msrb.mxu3 %v1604_v0  ;;  %962 = vmatpush.bf16.msra.mxu2 %v1224_v32 }
 0x320   :  { %919 = vmatpush.bf16.msra.mxu3 %v1231_v15 }
 0x324   :  { %920 = vmatpush.bf16.msra.mxu3 %v1230_v26 }
 0x328   :  { %921 = vmatpush.bf16.msra.mxu3 %v1229_v27 }
 0x32c   :  { %922 = vmatpush.bf16.msra.mxu3 %v1228_v28 }
 0x330   :  { %923 = vmatpush.bf16.msra.mxu3 %v1227_v29 }
 0x334   :  { %924 = vmatpush.bf16.msra.mxu3 %v1226_v30 }
 0x338   :  { %925 = vmatpush.bf16.msra.mxu3 %v1225_v31 }
 0x33c   :  { %926 = vmatpush.bf16.msra.mxu3 %v1224_v32 }
 0x382   :  { %v1657_v58 = vpop.f32.mrf.mxu3 }
 0x383   :  { %v499_v42 = vadd.f32 %v1657_v58, %v480_v40 }
 0x385   :  { %v504_v44 = vmax.f32 %v499_v42, 0.0 }
 0x38a   :  { %v1659_v59 = vpop.f32.mrf.mxu3 }
 0x38b   :  { %v502_v45 = vadd.f32 %v1659_v59, %v480_v40 }
 0x38d   :  { %v505_v46 = vmax.f32 %v502_v45, 0.0 }
 0x392   :  { %v768_v61 = vpop.f32.mrf.mxu3 }
 0x393   :  { %v774_v62 = vmul.f32 %v773_v60, %v768_v61  ;;  %v936_v61 = vperm.slane %v1597_v43, 7 }
 0x395   :  { %776 = vadd.xlane.f32.xlu0 %v774_v62 }
 0x39a   :  { %v770_v63 = vpop.f32.mrf.mxu3 }
 0x39b   :  { %v775_v1 = vmul.f32 %v773_v60, %v770_v63 }
 0x39d   :  { %778 = vadd.xlane.f32.xlu1 %v775_v1 }
 0x408   :  { %v777_v4 = vpop.xlane.xlu0 %776 }
 0x409   :  { %v804_v0 = vadd.f32 %v803_v3, %v777_v4 }
 0x40b   :  { %v808_v6 = vmul.f32 0.2, %v804_v0  ;;  %vm806_vm4 = vcmp.ge.f32.partialorder %v804_v0, 0.0 }
 0x40d   :  { %v810_v7 = vsel %vm806_vm4, %v804_v0, %v808_v6 }
 0x40e   :  { %v817_v8 = vsel %vm815_vm5, %v810_v7, -1e+30 }
 0x40f   :  { %819 = vmax.xlane.f32.xlu2 %v817_v8 }
 0x410   :  { %v779_v9 = vpop.xlane.xlu1 %778 }
 0x411   :  { %v805_v11 = vadd.f32 %v803_v3, %v779_v9 }
 0x413   :  { %v809_v12 = vmul.f32 0.2, %v805_v11  ;;  %vm807_vm6 = vcmp.ge.f32.partialorder %v805_v11, 0.0 }
 0x415   :  { %v811_v13 = vsel %vm807_vm6, %v805_v11, %v809_v12 }
 0x416   :  { %v818_v14 = vsel %vm816_vm7, %v811_v13, -1e+30 }
 0x417   :  { %821 = vmax.xlane.f32.xlu0 %v818_v14 }
 0x482   :  { %v820_v16 = vpop.xlane.xlu2 %819 }
 0x483   :  { %v823_v17 = vsub.f32 %v817_v8, %v820_v16 }
 0x485   :  { %v825_v18 = vmul.f32 1.442695, %v823_v17 }
 0x487   :  { %1309 = vpow2.f32 %v825_v18 }
 0x48a   :  { %v822_v19 = vpop.xlane.xlu0 %821 }
 0x48b   :  { %v824_v20 = vsub.f32 %v818_v14, %v822_v19 }
 0x48d   :  { %v1310_v21 = vpop.eup %1309  ;;  %v827_v22 = vmul.f32 1.442695, %v824_v20 }
 0x48e   :  { %v829_v23 = vmul.f32 %v1310_v21, %v813_v5  ;;  %v136_v5 = vld [vmem:[#allocation10 + $0x8] sm:$0xff] }
 0x48f   :  { %1311 = vpow2.f32 %v827_v22  ;;  %v954_v0 = vperm.slane %v136_v5, 0 }
 0x490   :  { %831 = vadd.xlane.f32.xlu1 %v829_v23 }
 0x495   :  { %v1312_v24 = vpop.eup %1311 }
 0x496   :  { %v830_v25 = vmul.f32 %v1312_v24, %v814_v10 }
 0x498   :  { %833 = vadd.xlane.f32.xlu2 %v830_v25 }
 0x503   :  { %v832_v33 = vpop.xlane.xlu1 %831 }
 0x504   :  { %v835_v34 = vmax.f32 %v832_v33, 1.0 }
 0x506   :  { %1313 = vrcp.f32 %v835_v34 }
 0x50b   :  { %v834_v35 = vpop.xlane.xlu2 %833 }
 0x50c   :  { %v1314_v36 = vpop.eup %1313  ;;  %v836_v37 = vmax.f32 %v834_v35, 1.0 }
 0x50d   :  { %v839_v38 = vmul.f32 %v1314_v36, %v829_v23 }
 0x50e   :  { %1315 = vrcp.f32 %v836_v37 }
 0x50f   :  { %858 = vmatmul.f32.vlgmr.msrb.gmra.mxu3 %v839_v38 }
 0x514   :  { %v1316_v39 = vpop.eup %1315 }
 0x515   :  { %v840_v41 = vmul.f32 %v1316_v39, %v830_v25 }
 0x517   :  { %861 = vmatmul.f32.gmra.mxu3 %v840_v41 }
 0x51f   :  { %927 = vmatmul.f32.vlgmr.msra.gmra.mxu3 %v504_v44 }
 0x527   :  { %930 = vmatmul.f32.gmra.mxu3 %v505_v46 }
 0x592   :  { %v859_v48 = vpop.f32.mrf.mxu3 }
 0x593   :  { %v860_v49 = vadd.f32 %v859_v48, %v841_v47 }
 0x595   :  { %v865_v50 = vmax.f32 %v860_v49, 0.0 }
 0x597   :  { %1190 = vst [vmem:[%s1687_s7 + $0x10] sm:$0xff] %v865_v50 }
 0x59a   :  { %v862_v51 = vpop.f32.mrf.mxu3 }
 0x59b   :  { %v863_v52 = vadd.f32 %v862_v51, %v841_v47 }
 0x59d   :  { %v866_v53 = vmax.f32 %v863_v52, 0.0 }
 0x59f   :  { %1191 = vst [vmem:[%s1687_s7 + $0x18] sm:$0xff] %v866_v53 }
 0x5a2   :  { %v928_v55 = vpop.f32.mrf.mxu3 }
 0x5a3   :  { %v929_v56 = vadd.f32 %v928_v55, %v870_v54 }
 0x5a5   :  { %v934_v57 = vmax.f32 %v929_v56, 0.0 }
 0x5a7   :  { %945 = vmatmul.f32.vlgmr.msrb.gmra.mxu0 %v934_v57 }
 0x5aa   :  { %v931_v58 = vpop.f32.mrf.mxu3 }
 0x5ab   :  { %v932_v59 = vadd.f32 %v931_v58, %v870_v54 }
 0x5ad   :  { %v935_v60 = vmax.f32 %v932_v59, 0.0 }
 0x5af   :  { %948 = vmatmul.f32.vlgmr.msrb.gmra.mxu1 %v935_v60 }
 0x624   :  { %v946_v62 = vpop.f32.mrf.mxu0 }
 0x625   :  { %v947_v63 = vadd.f32 %v946_v62, %v936_v61 }
 0x627   :  { %v952_v1 = vmax.f32 %v947_v63, 0.0 }
 0x629   :  { %963 = vmatmul.f32.vlgmr.msra.gmra.mxu2 %v952_v1 }
 0x62c   :  { %v949_v2 = vpop.f32.mrf.mxu1 }
 0x62d   :  { %v950_v3 = vadd.f32 %v949_v2, %v936_v61 }
 0x62f   :  { %v953_v4 = vmax.f32 %v950_v3, 0.0 }
 0x631   :  { %966 = vmatmul.f32.gmra.mxu2 %v953_v4 }
 0x6ac   :  { %v964_v6 = vpop.f32.mrf.mxu2 }
 0x6ad   :  { %v965_v7 = vadd.f32 %v964_v6, %v954_v0 }
 0x6af   :  { %v970_v8 = vsub.f32 0.0, %v965_v7 }
 0x6b1   :  { %v972_v9 = vmul.f32 1.442695, %v970_v8 }
 0x6b3   :  { %1317 = vpow2.f32 %v972_v9 }
 0x6b4   :  { %v967_v10 = vpop.f32.mrf.mxu2 }
 0x6b5   :  { %v968_v11 = vadd.f32 %v967_v10, %v954_v0 }
 0x6b7   :  { %v971_v12 = vsub.f32 0.0, %v968_v11 }
 0x6b9   :  { %v1318_v13 = vpop.eup %1317  ;;  %v974_v43 = vmul.f32 1.442695, %v971_v12 }
 0x6ba   :  { %v976_v14 = vadd.f32 1.0, %v1318_v13 }
 0x6bb   :  { %1319 = vpow2.f32 %v974_v43 }
 0x6bc   :  { %1321 = vrcp.f32 %v976_v14 }
 0x6c1   :  { %v1320_v15 = vpop.eup %1319 }
 0x6c2   :  { %v1322_v16 = vpop.eup %1321  ;;  %v977_v17 = vadd.f32 1.0, %v1320_v15 }
 0x6c3   :  { %980 = vst [vmem:[%s1687_s7] sm:$0xff] %v1322_v16 }
 0x6c4   :  { %1323 = vrcp.f32 %v977_v17 }
 0x6ca   :  { %v1324_v18 = vpop.eup %1323 }
 0x6cb   :  { %981 = vst [vmem:[%s1687_s7 + $0x8] sm:$0xff] %v1324_v18 }
 0x6cc   :  { %986 = vsyncpa [#allocation3], 1 }
 0x6cd   :  { %987 = vsyncpa [#allocation5], 1 }
 0x6ce   :  { %988 = vsyncpa [#allocation8], 1 }
 0x6cf   :  { %989 = vsyncpa [#allocation11], 1 }

</bundles_post_ra>
